<compile_context>
chip_gen: v7x
topology: tpu7x:2x2x1
jax: 0.10.0
libtpu: 0.0.40
codegen_flags: <defaults>
</compile_context>

<pallas_src>
import functools
import math

import jax
import jax.numpy as jnp
from jax.experimental import pallas as pl
from jax.experimental.pallas import tpu as pltpu


# ---------------------------------------------------------------------------
# Helpers: padded VMEM accounting + chip-aware budgets
# ---------------------------------------------------------------------------
def _cdiv(a, b):
    return -(-a // b)


def _round_up(x, m):
    return _cdiv(x, m) * m


def _sublane(itemsize):
    # sublane packing: 8 rows for 32-bit, 16 for bf16/f16, 32 for int8/fp8
    return 8 * max(1, 4 // int(itemsize))


def _padded_block_bytes(block_shape, dtype):
    """VMEM footprint of one block including (sublane, lane) tile padding."""
    itemsize = jnp.dtype(dtype).itemsize
    dims = [int(d) for d in block_shape]
    dims[-1] = _round_up(dims[-1], 128)
    if len(dims) >= 2:
        dims[-2] = _round_up(dims[-2], _sublane(itemsize))
    n = 1
    for d in dims:
        n *= d
    return n * itemsize


def _vmem_budget_and_limit():
    """(in-flight byte budget for double-buffered in+out blocks, vmem limit)."""
    try:
        cap = int(pltpu.get_tpu_info().vmem_capacity_bytes)
    except Exception:
        cap = 64 << 20  # v7x per-TensorCore VMEM (smallest current chip)
    # Double-buffered input + output blocks must fit `in_flight`; keep headroom
    # for compiler scratch on v7x (64 MiB) while still reaching the large-tile
    # regime (~85% of HBM roofline) on v5e / v6e (128 MiB).
    in_flight = min(24 << 20, cap // 4)
    vmem_limit = max(min(cap - (16 << 20), 64 << 20), in_flight + (8 << 20))
    return in_flight, vmem_limit


# ---------------------------------------------------------------------------
# Fast path: NCHW -> NHWC  (permute == (0, 2, 3, 1))
#
# Per grid step: load (1, C, tH, W), write one lane-dense output slab.
#   * W*C % 128 == 0     -> out array (B, H, W*C),          block (1, tH, W*C)
#   * (H*W*C) % 128 == 0 -> out array (B, H*W*C/128, 128),  block (1, tH*W*C/128, 128)
#   * otherwise          -> out array (B, H, W*C)  (masked narrow stores; rare)
# ---------------------------------------------------------------------------
def _nchw_to_nhwc_kernel(x_ref, o_ref):
    # x_ref: (1, C, tH, W);  o_ref: (1, rows, lanes) with rows*lanes == tH*W*C.
    rows, lanes = o_ref.shape[1], o_ref.shape[2]
    # Channel interleave for this tile, written as a single lane-dense slab.
    # TODO(synk): switch to pltpu.einshape / bitcast channel packing (bf16 C=2,
    # int8 C=4) or per-channel strided-lane stores once those lowerings are
    # verified; transpose + one reshape is the portable formulation.
    y = jnp.transpose(x_ref[0], (1, 2, 0))          # (tH, W, C)
    o_ref[0] = y.reshape(rows, lanes)


def _fast_path_plan(B, C, H, W, dtype, budget):
    sub = _sublane(jnp.dtype(dtype).itemsize)
    wc = W * C
    n = H * wc
    if wc % 128 == 0:
        lanes, fold, align = wc, False, sub
    elif n % 128 == 0:
        lanes, fold = 128, True
        # Tile flat size must be a multiple of 8*128 so the folded output block
        # keeps (sublane % 8 == 0, lane == 128).
        align = math.lcm((8 * 128) // math.gcd(wc, 8 * 128), sub)
    else:
        # TODO(synk): W*C and H*W*C not 128-aligned -> masked narrow stores.
        lanes, fold, align = wc, False, sub

    def rows_of(th):
        return (th * wc) // 128 if fold else th

    def in_flight(th):
        return 2 * (_padded_block_bytes((1, C, th, W), dtype)
                    + _padded_block_bytes((1, rows_of(th), lanes), dtype))

    if align >= H or in_flight(H) <= budget:
        th = H
    else:
        th = max(align, (H // align) * align)
        while th > align and in_flight(th) > budget:
            th -= align

    # v7x megacore: guarantee >=2 grid steps so both TensorCores get work.
    if B * _cdiv(H, th) < 2:
        half = _round_up(_cdiv(H, 2), align)
        if half < H:
            th = min(th, half)

    out_rows = n // 128 if fold else H
    return th, rows_of(th), lanes, out_rows


def _permute_nchw_to_nhwc(x):
    B, C, H, W = x.shape
    budget, vmem_limit = _vmem_budget_and_limit()
    tH, rows, lanes, out_rows = _fast_path_plan(B, C, H, W, x.dtype, budget)

    out_flat = pl.pallas_call(
        _nchw_to_nhwc_kernel,
        out_shape=jax.ShapeDtypeStruct((B, out_rows, lanes), x.dtype),
        grid_spec=pltpu.PrefetchScalarGridSpec(
            num_scalar_prefetch=0,
            grid=(B, _cdiv(H, tH)),
            in_specs=[pl.BlockSpec((1, C, tH, W), lambda b, h: (b, 0, h, 0))],
            out_specs=pl.BlockSpec((1, rows, lanes), lambda b, h: (b, h, 0)),
        ),
        compiler_params=pltpu.CompilerParams(
            dimension_semantics=("parallel", "parallel"),
            vmem_limit_bytes=vmem_limit,
        ),
    )(x)
    # Free (layout-only) reshape of the lane-dense slab back to NHWC.
    return out_flat.reshape(B, H, W, C)


# ---------------------------------------------------------------------------
# Generic 4D fallback (batch axis stays leading), tiled + VMEM-guarded.
# Tiles along the input axis that becomes output axis 1.
# ---------------------------------------------------------------------------
def _generic_kernel(x_ref, o_ref, *, perm3):
    o_ref[0] = jnp.transpose(x_ref[0], perm3)


def _permute_4d_batch_leading(x, permute):
    B, S1, S2, S3 = x.shape
    out_shape = tuple(x.shape[p] for p in permute)
    q = permute[1]                              # tiled input axis
    itemsize = jnp.dtype(x.dtype).itemsize
    budget, vmem_limit = _vmem_budget_and_limit()

    # (sublane, lane) alignment for a partial tile on the *input* block.
    if q == 3:
        align = 128
    elif q == 2:
        align = _sublane(itemsize)
    else:
        align = 1
    S = x.shape[q]
    align = min(align, S)

    def in_flight(t):
        in_blk = [1, S1, S2, S3]
        in_blk[q] = t
        out_blk = [1, t, out_shape[2], out_shape[3]]
        return 2 * (_padded_block_bytes(in_blk, x.dtype)
                    + _padded_block_bytes(out_blk, x.dtype))

    if in_flight(S) <= budget:
        t = S
    else:
        t = max(align, (S // align) * align)
        while t > align and in_flight(t) > budget:
            t -= align

    if B * _cdiv(S, t) < 2 and S > align:        # keep both v7x cores busy
        half = _round_up(_cdiv(S, 2), align)
        if half < S:
            t = min(t, half)

    in_block = [1, S1, S2, S3]
    in_block[q] = t

    def in_map(b, j):
        idx = [b, 0, 0, 0]
        idx[q] = j
        return tuple(idx)

    perm3 = tuple(p - 1 for p in permute[1:])
    # TODO(synk): when out_shape[3] < 128, also fold the output into a
    # lane-dense slab like the NCHW->NHWC fast path.
    return pl.pallas_call(
        functools.partial(_generic_kernel, perm3=perm3),
        out_shape=jax.ShapeDtypeStruct(out_shape, x.dtype),
        grid_spec=pltpu.PrefetchScalarGridSpec(
            num_scalar_prefetch=0,
            grid=(B, _cdiv(S, t)),
            in_specs=[pl.BlockSpec(tuple(in_block), in_map)],
            out_specs=pl.BlockSpec((1, t, out_shape[2], out_shape[3]),
                                   lambda b, j: (b, j, 0, 0)),
        ),
        compiler_params=pltpu.CompilerParams(
            dimension_semantics=("parallel", "parallel"),
            vmem_limit_bytes=vmem_limit,
        ),
    )(x)


# ---------------------------------------------------------------------------
# Dispatcher + module wrapper
# ---------------------------------------------------------------------------
def pallas_permute(x, permute):
    permute = tuple(int(p) for p in permute)
    if permute == tuple(range(x.ndim)):
        return x
    if x.ndim == 4 and permute == (0, 2, 3, 1):
        return _permute_nchw_to_nhwc(x)
    if x.ndim == 4 and permute[0] == 0:
        return _permute_4d_batch_leading(x, permute)
    # TODO(synk): no tiled Pallas path for permutations that move the leading
    # axis or for other ranks; fall back to XLA's transpose.
    return jnp.transpose(x, permute)


class TransposePallas:
    """JAX/Pallas equivalent of the PyTorch `Transpose` module."""

    def __init__(self, permute):
        self.permute = tuple(permute)

    def __call__(self, x):
        return pallas_permute(x, self.permute)


if __name__ == "__main__":
    key = jax.random.PRNGKey(0)
    k1, k2 = jax.random.split(key)

    # Fast path: NCHW -> NHWC.  channels=8 so every stored row is exactly
    # W*C = 128 lanes -> unmasked, lane-dense stores.
    x = jax.random.normal(k1, (2, 8, 16, 16), dtype=jnp.float32)
    permute = (0, 2, 3, 1)
    out = jax.block_until_ready(TransposePallas(permute)(x))
    ref = jnp.transpose(x, permute)
    assert out.shape == ref.shape, (out.shape, ref.shape)
    assert out.dtype == ref.dtype, (out.dtype, ref.dtype)
    assert jnp.array_equal(out, ref), "NCHW->NHWC mismatch vs reference permute"

    # Generic batch-leading fallback: swap the two minor axes.
    x2 = jax.random.normal(k2, (2, 4, 128, 128), dtype=jnp.float32)
    permute2 = (0, 1, 3, 2)
    out2 = jax.block_until_ready(TransposePallas(permute2)(x2))
    ref2 = jnp.transpose(x2, permute2)
    assert out2.shape == ref2.shape and out2.dtype == ref2.dtype
    assert jnp.array_equal(out2, ref2), "generic permute mismatch vs reference"

    print("KERNEL_OK")
</pallas_src>

<mosaic_0001>
module attributes {stable_mosaic.version = 11 : i64} {
  func.func @_nchw_to_nhwc_kernel(%arg0: i32, %arg1: i32, %arg2: memref<1x8x16x16xf32, #tpu.memory_space<vmem>>, %arg3: memref<1x16x128xf32, #tpu.memory_space<vmem>>) attributes {dimension_semantics = [#tpu.dimension_semantics<parallel>, #tpu.dimension_semantics<parallel>], iteration_bounds = array<i64: 2, 1>, scalar_prefetch = 0 : i64, scratch_operands = 0 : i64, tpu.core_type = #tpu.core_type<tc>, window_params = [{transform_indices = @transform_0, window_bounds = array<i64: 1, 8, 16, 16>}, {transform_indices = @transform_1, window_bounds = array<i64: 1, 16, 128>}]} {
    %c0 = arith.constant 0 : index
    %c0_0 = arith.constant 0 : index
    %c0_1 = arith.constant 0 : index
    %c0_2 = arith.constant 0 : index
    %0 = vector.load %arg2[%c0, %c0_0, %c0_1, %c0_2] : memref<1x8x16x16xf32, #tpu.memory_space<vmem>>, vector<1x8x16x16xf32>
    %1 = vector.shape_cast %0 : vector<1x8x16x16xf32> to vector<8x16x16xf32>
    %2 = tpu.transpose %1, [1, 2, 0] : vector<8x16x16xf32> -> vector<16x16x8xf32>
    %3 = vector.shape_cast %2 : vector<16x16x8xf32> to vector<16x128xf32>
    %c0_3 = arith.constant 0 : index
    %c0_4 = arith.constant 0 : index
    %c0_5 = arith.constant 0 : index
    %4 = vector.load %arg3[%c0_3, %c0_4, %c0_5] : memref<1x16x128xf32, #tpu.memory_space<vmem>>, vector<1x16x128xf32>
    %5 = vector.shape_cast %4 : vector<1x16x128xf32> to vector<16x128xf32>
    %6 = vector.shape_cast %3 : vector<16x128xf32> to vector<1x16x128xf32>
    tpu.vector_store %arg3[%c0_3, %c0_4, %c0_5], %6 {strides = array<i32>} : memref<1x16x128xf32, #tpu.memory_space<vmem>>, vector<1x16x128xf32>,
    return
  }
  func.func @transform_0(%arg0: i32, %arg1: i32) -> (i32, i32, i32, i32) {
    %c0_i32 = arith.constant 0 : i32
    %c0_i32_0 = arith.constant 0 : i32
    %c0_i32_1 = arith.constant 0 : i32
    return %arg0, %c0_i32, %arg1, %c0_i32_0 : i32, i32, i32, i32
  }
  func.func @transform_1(%arg0: i32, %arg1: i32) -> (i32, i32, i32) {
    %c0_i32 = arith.constant 0 : i32
    %c0_i32_0 = arith.constant 0 : i32
    return %arg0, %arg1, %c0_i32 : i32, i32, i32
  }
}

</mosaic_0001>

<bundles_post_ra>
// kernel: tpu_custom_call.1
= control target key start
LH: loop header
LB: loop body
LE: loop exit
PB: predicated region body
PF: predicated region fallthrough
CT: control target
= control target key end

     0   :  { %6 = vsyncpa [#allocation3], 0  ;;  %s3392_s0 = inlined_call_operand.hbm [shape: f32[2,8,16,16], index: 0, kind: input, shape index: {}]   ;;  %s3393_s1 = inlined_call_operand.hbm [shape: f32[2,16,128], index: 1, kind: output, shape index: {}]  }
   0x1   :  { %8 = vsyncpa [#allocation3 + $0x1], 0 }
   0x2   :  { %9 = vsyncpa [#allocation4], 0 }
   0x3   :  { %11 = vsyncpa [#allocation4 + $0x1], 0  ;;  %s2847_s6 = smov 0   ;;  %s2849_s7 = smov 0  }
   0x4   :  { %s2851_s8 = smov 0   ;;  %s2853_s9 = smov 0  }
   0x5   :  { %s2855_s10 = smov 0   ;;  %s2857_s11 = smov 0  }
   0x6 LB: > { %s2569_s12 = sadd.s32 4294967295, %s2813_s11   ;;  %s2570_s13 = sadd.s32 4294967294, %s2813_s11   ;;  %s2813_s11 = sphi %s2857_s11, %s17_s11   ;;  %s2809_s10 = sphi %s2855_s10, %s3408_s10   ;;  %s2805_s9 = sphi %s2853_s9, %s3407_s9   ;;  %s2801_s8 = sphi %s2851_s8, %s3406_s8   ;;  %s2797_s7 = sphi %s2849_s7, %s3405_s7   ;;  %s2793_s6 = sphi %s2847_s6, %s3404_s6  }
   0x7   : > { %s29_s14 = sadd.s32 1, %s2809_s10  ;;  %s38_s15 = sadd.s32 1, %s2801_s8 }
   0x8   : > { %p31_p0 = scmp.ge.s32.totalorder %s29_s14, 2  ;;  %p45_p1 = scmp.ne.s32.totalorder %s2801_s8, %s2797_s7 }
   0x9   : > { %p46_p2 = scmp.eq.s32.totalorder %s2813_s11, 0  ;;  %p51_p3 = scmp.ne.s32.totalorder %s2797_s7, %s2793_s6 }
   0xa   : > { %s3410_s14 = smov (%p31_p0, %s29_s14), 0  ;;  %p52_p5 = scmp.eq.s32.totalorder %s2569_s12, 0 }
   0xb   : > { %p2888_p4 = por %p46_p2, %p45_p1  ;;  %s33_s17 = ssub.s32 %s2809_s10, %s3410_s14 }
   0xc   : > { %p77_p6 = scmp.eq.s32.totalorder %s2569_s12, 1  ;;  %p36_p7 = scmp.eq.s32.totalorder %s33_s17, 0 }
   0xd   : > { %p2894_p8 = por %p52_p5, %p51_p3  ;;  %p83_p10 = scmp.eq.s32.totalorder %s2570_s13, 1 }
   0xe   : > { %p2898_p9 = por %p77_p6, %p45_p1  ;;  %p2630_p13 = scmp.lt.s32.totalorder %s2813_s11, 2 }
   0xf   : > { %s2903_s20 = scalar_select %p36_p7, %s2801_s8, %s38_s15  }
  0x10   : > { %s3397_s19 = scalar_select %p2898_p9, 1, 0 }
  0x11   : > { %p2905_p11 = por %p83_p10, %p51_p3  ;;  %s103_s22 = sand.u32 1, %s2801_s8  }
  0x12   : > { %s2573_s23 = sshll.u32 %s103_s22, 7  ;;  %s2616_s24 = sshll.u32 %s2809_s10, 11 }
  0x13   : > { %s3398_s21 = scalar_select %p2905_p11, 1, 0 }
  0x14   : > { %s2916_s27 = scalar_lea.hbm %s3392_s0, %s2616_s24  ;;  %s107_s28 = scalar_lea.vmem [#allocation2], %s2573_s23 }
  0x15   : > { %s116_s29 = sshll.u32 %s107_s28, 4  ;;  %p2922_p0 = pnand %p2630_p13, %p2888_p4  ;;  %s2918_s29 = int_to_ptr.vmem [resolvable:$true] %s116_s29 }
  0x16   : > { %s2927_s2 = scalar_lea.sflag [#allocation3], %s103_s22  ;;  %s2701_s3 = scalar_lea.hbm %s2916_s27, 2048 }
  0x17   : > { %p2702_p2 = scmp.ne.s32.totalorder %s2916_s27, %s2701_s3  ;;  %p2703_p3 = pneg %p2922_p0 }
  0x18   : > { %s2706_s12 = scalar_lea.hbm %s3392_s0, 4096  ;;  %p2707_p4 = scmp.lt.u32.totalorder %s2916_s27, %s3392_s0 }
  0x19   : > { %p2704_p5 = pnand %p2703_p3, %p2702_p2  ;;  %p2708_p7 = scmp.lt.u32.totalorder %s2706_s12, %s2701_s3 }
  0x1a   : > { %p2710_p13 = scmp.lt.u32.totalorder %s2701_s3, %s2916_s27 }
  0x1b   : > { %p2705_p6 = pneg %p2704_p5  ;;  %p2709_p10 = por %p2708_p7, %p2707_p4 }
  0x1d   : > { %p2711_p12 = por %p2710_p13, %p2709_p10 }
  0x1f   : > { %p2712_p1 = pnand %p2711_p12, %p2705_p6 }
  0x21   : > { %2715 = shalt.err (!%p2712_p1)
}
  0x22   : > { %s2716_s16 = scalar_lea.vmem %s2918_s29, 2048  ;;  %s2815_s17 = smov [#allocation2]  }
  0x23   : > { %p2717_p2 = scmp.ne.s32.totalorder %s2918_s29, %s2716_s16  ;;  %s2721_s22 = sshll.u32 %s2815_s17, 4  ;;  %s2722_s22 = int_to_ptr.vmem [resolvable:$false] %s2721_s22 }
  0x24   : > { %s2723_s23 = scalar_lea.vmem %s2722_s22, 4096  ;;  %p2724_p9 = scmp.lt.s32.totalorder %s2918_s29, %s2722_s22 }
  0x25   : > { %p2719_p5 = pnand %p2717_p2, %p2703_p3  ;;  %p2725_p4 = scmp.lt.s32.totalorder %s2723_s23, %s2716_s16 }
  0x27   : > { %p2720_p11 = pneg %p2719_p5  ;;  %p2726_p7 = por %p2725_p4, %p2724_p9 }
  0x29   : > { %p2727_p10 = pnand %p2726_p7, %p2720_p11 }
  0x2b   : > { %2730 = shalt.err (!%p2727_p10)
}
  0x2c   : > { %s2816_s24 = smov 128   ;;  %s2817_s25 = smov 8  }
  0x2d   : > { %2625 = dma.hbm_to_vmem [thread:$0]  (!%p2922_p0), %s2916_s27, 2048, %s2918_s29, %s2927_s2, %s2816_s24, %s2816_s24, %s2817_s25  }
  0x2e   : > { %p124_p12 = scmp.lt.s32.totalorder %s2813_s11, 3  ;;  %p3400_p1 = scmp.ge.s32.totalorder %s2813_s11, 1 }
  0x30   : > { %p125_p3 = pnand %p3400_p1, %p124_p12 }
  0x31   : > { %s2959_s26 = sand.u32 (!%p125_p3), 1, %s2797_s7  }
  0x32   : > { %128 = sbr.rel (%p125_p3) target bundleno = 584 (0x248), region = 24  ;;  %s2577_s28 = sshll.u32 (!%p125_p3), %s2959_s26, 7 }
  0x33   : > { %s131_s3 = scalar_lea.sflag (!%p125_p3), [#allocation3], %s2959_s26  ;;  %s2963_s4 = scalar_lea.vmem (!%p125_p3), [#allocation2], %s2577_s28 }
  0x39   : > { %2784 = dma.done.wait (%p2894_p8), %s131_s3, 2048  }
  0x3a   : > { %2786 = vsyncadd (%p2894_p8), %s131_s3, 4294965248  ;;  %v157_v0 = vld [vmem:[%s2963_s4 + $0x10] sm:$0xff]  ;;  %v155_v1 = vld [vmem:[%s2963_s4] sm:$0xff]  ;;  %v2818_v22 = vmov 1983009808   ;;  %v432_v24 = vlaneseq  ;;  %s2820_s18 = smov 16  }
  0x3b   : > { %203 = vxpose.xlu1.b32.start [1/2] (short) (narrow) %v157_v0, 16  ;;  %171 = vxpose.xlu0.b32.start [1/2] (short) (narrow) %v155_v1, 16  ;;  %v158_v2 = vld [vmem:[%s2963_s4 + $0x18] sm:$0xff]  ;;  %v156_v3 = vld [vmem:[%s2963_s4 + $0x8] sm:$0xff]  ;;  %v161_v4 = vld [vmem:[%s2963_s4 + $0x30] sm:$0xff]  ;;  %v430_v23 = vunpack.c.l.s4 %v2818_v22  ;;  %s2821_s27 = smov 8  }
  0x3c   : > { %v159_v5 = vld [vmem:[%s2963_s4 + $0x20] sm:$0xff]  ;;  %v162_v6 = vld [vmem:[%s2963_s4 + $0x38] sm:$0xff]  ;;  %v160_v7 = vld [vmem:[%s2963_s4 + $0x28] sm:$0xff]  ;;  %v433_v28 = vshrl.u32 %v432_v24, 7  ;;  %v2819_v36 = vmov 1934713408  }
  0x3d   : > { %v165_v8 = vld [vmem:[%s2963_s4 + $0x50] sm:$0xff]  ;;  %v163_v9 = vld [vmem:[%s2963_s4 + $0x40] sm:$0xff]  ;;  %v166_v10 = vld [vmem:[%s2963_s4 + $0x58] sm:$0xff]  ;;  %v431_v27 = vunpack.c.0.s8 %v430_v23  ;;  %v494_v37 = vunpack.c.l.s4 %v2819_v36  ;;  %s2822_s29 = smov 24   ;;  %s2823_s30 = smov 32   ;;  %vm2419_vm0 = vcmask 64512  }
  0x3e   : > { %v164_v11 = vld [vmem:[%s2963_s4 + $0x48] sm:$0xff]  ;;  %v169_v12 = vld [vmem:[%s2963_s4 + $0x70] sm:$0xff]  ;;  %v167_v13 = vld [vmem:[%s2963_s4 + $0x60] sm:$0xff]  ;;  %s2824_s2 = smov 40   ;;  %s2825_s5 = smov 48   ;;  %vm2422_vm1 = vcmask 130048  }
  0x3f   : > { %204 = vxpose.xlu1.b32.end [2/2] (short) (narrow) %v158_v2, 16  ;;  %172 = vxpose.xlu0.b32.end [2/2] (short) (narrow) %v156_v3, 16  ;;  %v170_v14 = vld [vmem:[%s2963_s4 + $0x78] sm:$0xff]  ;;  %v168_v15 = vld [vmem:[%s2963_s4 + $0x68] sm:$0xff]  ;;  %v2993_v31 = vsub.s32 %v431_v27, %v433_v28  ;;  %v495_v42 = vunpack.c.0.s8 %v494_v37  ;;  %s2826_s12 = smov 56   ;;  %s2827_s13 = smov 64  }
  0x40   : > { %s2828_s15 = smov 72   ;;  %s2829_s16 = smov 80   ;;  %vm2425_vm2 = vcmask 195584   ;;  %vm2428_vm3 = vcmask 261120   ;;  %vm2431_vm4 = vcmask 326656   ;;  %vm2434_vm5 = vcmask 392192  }
  0x41   : > { %v3003_v50 = vsub.s32 %v495_v42, %v433_v28  ;;  %s2830_s17 = smov 88   ;;  %s2831_s22 = smov 96   ;;  %vm2437_vm6 = vcmask 457728   ;;  %vm2440_vm7 = vcmask 523264   ;;  %vm2443_vm8 = vcmask 588800  }
  0x42   : > { %s2832_s23 = smov 104   ;;  %s2833_s24 = smov 112   ;;  %vm2446_vm9 = vcmask 654336   ;;  %vm2449_vm10 = vcmask 719872   ;;  %vm2452_vm11 = vcmask 785408   ;;  %vm2455_vm12 = vcmask 850944  }
  0x43   : > { %267 = vxpose.xlu1.b32.start [1/2] (short) (narrow) %v161_v4, 16  ;;  %235 = vxpose.xlu0.b32.start [1/2] (short) (narrow) %v159_v5, 16  ;;  %s2834_s25 = smov 120   ;;  %s2578_s28 = sshll.u32 %s2959_s26, 4  ;;  %vm2458_vm13 = vcmask 916480   ;;  %vm2461_vm14 = vcmask 982016  }
  0x44   : > { %s152_s3 = scalar_lea.vmem [#allocation5], %s2578_s28  ;;  %p3401_p9 = scmp.ne.s32.totalorder %s3397_s19, 0 }
  0x45   : > { %s2482_s4 = sshll.u32 %s152_s3, 4  ;;  %s3335_s4 = int_to_ptr.vmem [resolvable:$true] %s2482_s4 }
  0x47   : > { %268 = vxpose.xlu1.b32.end [2/2] (short) (narrow) %v162_v6, 16  ;;  %236 = vxpose.xlu0.b32.end [2/2] (short) (narrow) %v160_v7, 16 }
  0x4b   : > { %331 = vxpose.xlu1.b32.start [1/2] (short) (narrow) %v165_v8, 16  ;;  %299 = vxpose.xlu0.b32.start [1/2] (short) (narrow) %v163_v9, 16 }
  0x4f   : > { %332 = vxpose.xlu1.b32.end [2/2] (short) (narrow) %v166_v10, 16  ;;  %300 = vxpose.xlu0.b32.end [2/2] (short) (narrow) %v164_v11, 16 }
  0x53   : > { %395 = vxpose.xlu1.b32.start [1/2] (short) (narrow) %v169_v12, 16  ;;  %363 = vxpose.xlu0.b32.start [1/2] (short) (narrow) %v167_v13, 16 }
  0x57   : > { %396 = vxpose.xlu1.b32.end [2/2] (short) (narrow) %v170_v14, 16  ;;  %364 = vxpose.xlu0.b32.end [2/2] (short) (narrow) %v168_v15, 16 }
  0xbb   : > { %v219_v16 = vpop.trf.xlu1  ;;  %v187_v17 = vpop.trf.xlu0 }
  0xbf   : > { %v2985_v18 = vpop.trf.xlu1  ;;  %v2987_v19 = vpop.trf.xlu0 }
  0xc3   : > { %v283_v20 = vpop.trf.xlu1  ;;  %v251_v21 = vpop.trf.xlu0 }
  0xc4   : > { %v443_v32 = vcombine.low %v219_v16, %v283_v20  ;;  %v427_v33 = vcombine.low %v187_v17, %v251_v21  ;;  %v444_v51 = vcombine.high %v219_v16, %v283_v20  ;;  %v428_v52 = vcombine.high %v187_v17, %v251_v21 }
  0xc6   : > { %v451_v38 = vrot.slane %v443_v32, %v2993_v31  ;;  %v435_v39 = vrot.slane %v427_v33, %v2993_v31  ;;  %v458_v60 = vrot.slane %v444_v51, %v2993_v31  ;;  %v442_v61 = vrot.slane %v428_v52, %v2993_v31 }
  0xc7   : > { %v2989_v25 = vpop.trf.xlu1  ;;  %v2991_v26 = vpop.trf.xlu0 }
  0xc8   : > { %v491_v49 = vcombine.low %v435_v39, %v451_v38  ;;  %v492_v59 = vcombine.high %v435_v39, %v451_v38  ;;  %v507_v7 = vcombine.low %v442_v61, %v458_v60  ;;  %v579_v10 = vcombine.low %v2985_v18, %v2989_v25 }
  0xc9   : > { %v563_v11 = vcombine.low %v2987_v19, %v2991_v26  ;;  %v508_v17 = vcombine.high %v442_v61, %v458_v60  ;;  %v580_v37 = vcombine.high %v2985_v18, %v2989_v25  ;;  %v564_v38 = vcombine.high %v2987_v19, %v2991_v26 }
  0xca   : > { %v499_v57 = vrot.slane %v491_v49, %v3003_v50  ;;  %v506_v4 = vrot.slane %v492_v59, %v3003_v50  ;;  %v515_v16 = vrot.slane %v507_v7, %v3003_v50  ;;  %v587_v20 = vrot.slane %v579_v10, %v2993_v31 }
  0xcb   : > { %v347_v29 = vpop.trf.xlu1  ;;  %v315_v30 = vpop.trf.xlu0  ;;  %v571_v21 = vrot.slane %v563_v11, %v2993_v31  ;;  %v522_v28 = vrot.slane %v508_v17, %v3003_v50 }
  0xcd   : > { %v627_v32 = vcombine.low %v571_v21, %v587_v20  ;;  %v628_v42 = vcombine.high %v571_v21, %v587_v20 }
  0xcf   : > { %v2995_v34 = vpop.trf.xlu1  ;;  %v2997_v35 = vpop.trf.xlu0 }
  0xd3   : > { %v411_v40 = vpop.trf.xlu1  ;;  %v379_v41 = vpop.trf.xlu0 }
  0xd4   : > { %v475_v43 = vcombine.low %v347_v29, %v411_v40  ;;  %v459_v44 = vcombine.low %v315_v30, %v379_v41  ;;  %v476_v47 = vcombine.high %v347_v29, %v411_v40  ;;  %v460_v48 = vcombine.high %v315_v30, %v379_v41 }
  0xd6   : > { %v483_v45 = vrot.slane %v475_v43, %v2993_v31  ;;  %v467_v46 = vrot.slane %v459_v44, %v2993_v31  ;;  %v490_v55 = vrot.slane %v476_v47, %v2993_v31  ;;  %v474_v56 = vrot.slane %v460_v48, %v2993_v31 }
  0xd7   : > { %v412_v0 = vpop.trf.xlu1  ;;  %v380_v1 = vpop.trf.xlu0  ;;  %v594_v43 = vrot.slane %v580_v37, %v2993_v31  ;;  %v578_v44 = vrot.slane %v564_v38, %v2993_v31 }
  0xd8   : > { %v523_v53 = vcombine.low %v467_v46, %v483_v45  ;;  %v524_v54 = vcombine.high %v467_v46, %v483_v45  ;;  %v539_v3 = vcombine.low %v474_v56, %v490_v55  ;;  %v611_v5 = vcombine.low %v2995_v34, %v412_v0 }
  0xd9   : > { %v595_v6 = vcombine.low %v2997_v35, %v380_v1  ;;  %v540_v13 = vcombine.high %v474_v56, %v490_v55  ;;  %v612_v29 = vcombine.high %v2995_v34, %v412_v0  ;;  %v596_v30 = vcombine.high %v2997_v35, %v380_v1 }
  0xda   : > { %v531_v58 = vrot.slane %v523_v53, %v3003_v50  ;;  %v538_v2 = vrot.slane %v524_v54, %v3003_v50  ;;  %v547_v12 = vrot.slane %v539_v3, %v3003_v50  ;;  %v619_v14 = vrot.slane %v611_v5, %v2993_v31 }
  0xdb   : > { %v603_v15 = vrot.slane %v595_v6, %v2993_v31  ;;  %v554_v24 = vrot.slane %v540_v13, %v3003_v50  ;;  %v626_v41 = vrot.slane %v612_v29, %v2993_v31  ;;  %v610_v34 = vrot.slane %v596_v30, %v2993_v31 }
  0xdc   : > { %v556_v62 = vcombine.high %v499_v57, %v531_v58  ;;  %v555_v63 = vcombine.low %v499_v57, %v531_v58  ;;  %v558_v8 = vcombine.high %v506_v4, %v538_v2  ;;  %v557_v9 = vcombine.low %v506_v4, %v538_v2 }
  0xdd   : > { %v560_v22 = vcombine.high %v515_v16, %v547_v12  ;;  %v559_v23 = vcombine.low %v515_v16, %v547_v12  ;;  %v659_v27 = vcombine.low %v603_v15, %v619_v14  ;;  %v562_v33 = vcombine.high %v522_v28, %v554_v24 }
  0xde   : > { %731 = vxpose.xlu1.b32.start.end [1/1] (short) (narrow) %v556_v62, 16  ;;  %699 = vxpose.xlu0.b32.start.end [1/1] (short) (narrow) %v555_v63, 16  ;;  %v561_v36 = vcombine.low %v522_v28, %v554_v24  ;;  %v660_v40 = vcombine.high %v603_v15, %v619_v14  ;;  %v635_v35 = vrot.slane %v627_v32, %v3003_v50 }
  0xdf   : > { %v667_v39 = vrot.slane %v659_v27, %v3003_v50  ;;  %v675_v26 = vcombine.low %v610_v34, %v626_v41  ;;  %v642_v45 = vrot.slane %v628_v42, %v3003_v50  ;;  %v643_v46 = vcombine.low %v578_v44, %v594_v43 }
  0xe0   : > { %v674_v19 = vrot.slane %v660_v40, %v3003_v50  ;;  %v676_v51 = vcombine.high %v610_v34, %v626_v41  ;;  %v644_v53 = vcombine.high %v578_v44, %v594_v43 }
  0xe1   : > { %v692_v18 = vcombine.high %v635_v35, %v667_v39  ;;  %v691_v25 = vcombine.low %v635_v35, %v667_v39  ;;  %v683_v49 = vrot.slane %v675_v26, %v3003_v50  ;;  %v651_v52 = vrot.slane %v643_v46, %v3003_v50 }
  0xe2   : > { %v694_v47 = vcombine.high %v642_v45, %v674_v19  ;;  %v693_v48 = vcombine.low %v642_v45, %v674_v19  ;;  %v690_v56 = vrot.slane %v676_v51, %v3003_v50  ;;  %v658_v57 = vrot.slane %v644_v53, %v3003_v50 }
  0xe3   : > { %795 = vxpose.xlu1.b32.start.end [1/1] (short) (narrow) %v558_v8, 16  ;;  %763 = vxpose.xlu0.b32.start.end [1/1] (short) (narrow) %v557_v9, 16  ;;  %v696_v54 = vcombine.high %v651_v52, %v683_v49  ;;  %v695_v55 = vcombine.low %v651_v52, %v683_v49 }
  0xe4   : > { %v698_v58 = vcombine.high %v658_v57, %v690_v56  ;;  %v697_v59 = vcombine.low %v658_v57, %v690_v56 }
  0xe8   : > { %859 = vxpose.xlu1.b32.start.end [1/1] (short) (narrow) %v560_v22, 16  ;;  %827 = vxpose.xlu0.b32.start.end [1/1] (short) (narrow) %v559_v23, 16 }
  0xed   : > { %923 = vxpose.xlu1.b32.start.end [1/1] (short) (narrow) %v562_v33, 16  ;;  %891 = vxpose.xlu0.b32.start.end [1/1] (short) (narrow) %v561_v36, 16 }
  0xf2   : > { %987 = vxpose.xlu1.b32.start.end [1/1] (short) (narrow) %v692_v18, 16  ;;  %955 = vxpose.xlu0.b32.start.end [1/1] (short) (narrow) %v691_v25, 16 }
  0xf7   : > { %1051 = vxpose.xlu1.b32.start.end [1/1] (short) (narrow) %v694_v47, 16  ;;  %1019 = vxpose.xlu0.b32.start.end [1/1] (short) (narrow) %v693_v48, 16 }
  0xfc   : > { %1115 = vxpose.xlu1.b32.start.end [1/1] (short) (narrow) %v696_v54, 16  ;;  %1083 = vxpose.xlu0.b32.start.end [1/1] (short) (narrow) %v695_v55, 16 }
 0x101   : > { %1179 = vxpose.xlu1.b32.start.end [1/1] (short) (narrow) %v698_v58, 16  ;;  %1147 = vxpose.xlu0.b32.start.end [1/1] (short) (narrow) %v697_v59, 16 }
 0x15e   : > { %v747_v60 = vpop.trf.xlu1  ;;  %v715_v61 = vpop.trf.xlu0 }
 0x162   : > { %v748_v62 = vpop.trf.xlu1  ;;  %v716_v63 = vpop.trf.xlu0 }
 0x166   : > { %v811_v0 = vpop.trf.xlu1  ;;  %v779_v1 = vpop.trf.xlu0 }
 0x167   : > { %v1227_v2 = vcombine.low %v747_v60, %v811_v0  ;;  %v1228_v3 = vcombine.high %v747_v60, %v811_v0  ;;  %v1211_v4 = vcombine.low %v715_v61, %v779_v1  ;;  %v1212_v5 = vcombine.high %v715_v61, %v779_v1 }
 0x169   : > { %v1235_v6 = vrot.slane %v1227_v2, %v2993_v31  ;;  %v1242_v7 = vrot.slane %v1228_v3, %v2993_v31  ;;  %v1219_v8 = vrot.slane %v1211_v4, %v2993_v31  ;;  %v1226_v9 = vrot.slane %v1212_v5, %v2993_v31 }
 0x16a   : > { %v812_v10 = vpop.trf.xlu1  ;;  %v780_v11 = vpop.trf.xlu0 }
 0x16b   : > { %v1275_v12 = vcombine.low %v1219_v8, %v1235_v6  ;;  %v1276_v13 = vcombine.high %v1219_v8, %v1235_v6  ;;  %v1291_v14 = vcombine.low %v1226_v9, %v1242_v7  ;;  %v1292_v15 = vcombine.high %v1226_v9, %v1242_v7 }
 0x16c   : > { %v1499_v16 = vcombine.low %v748_v62, %v812_v10  ;;  %v1500_v17 = vcombine.high %v748_v62, %v812_v10  ;;  %v1483_v20 = vcombine.low %v716_v63, %v780_v11  ;;  %v1484_v21 = vcombine.high %v716_v63, %v780_v11 }
 0x16d   : > { %v1283_v22 = vrot.slane %v1275_v12, %v3003_v50  ;;  %v1290_v23 = vrot.slane %v1276_v13, %v3003_v50  ;;  %v1299_v24 = vrot.slane %v1291_v14, %v3003_v50  ;;  %v1306_v27 = vrot.slane %v1292_v15, %v3003_v50 }
 0x16e   : > { %v1507_v28 = vrot.slane %v1499_v16, %v2993_v31  ;;  %v1514_v29 = vrot.slane %v1500_v17, %v2993_v31  ;;  %v1491_v30 = vrot.slane %v1483_v20, %v2993_v31  ;;  %v1498_v32 = vrot.slane %v1484_v21, %v2993_v31  ;;  %v875_v33 = vpop.trf.xlu1  ;;  %v843_v36 = vpop.trf.xlu0 }
 0x16f   : > { %v2579_v37 = vcombine.low %v1283_v22, %v1290_v23  ;;  %v2581_v38 = vcombine.high %v1283_v22, %v1290_v23  ;;  %v2583_v39 = vcombine.low %v1299_v24, %v1306_v27  ;;  %v2585_v40 = vcombine.high %v1299_v24, %v1306_v27 }
 0x170   : > { %v1547_v41 = vcombine.low %v1491_v30, %v1507_v28  ;;  %v1548_v34 = vcombine.high %v1491_v30, %v1507_v28  ;;  %v1563_v35 = vcombine.low %v1498_v32, %v1514_v29  ;;  %v1564_v42 = vcombine.high %v1498_v32, %v1514_v29 }
 0x171   : > { %v1763_v43 = vrot.slane %v2579_v37, %v2993_v31  ;;  %v1779_v44 = vrot.slane %v2581_v38, %v2993_v31  ;;  %v1795_v18 = vrot.slane %v2583_v39, %v2993_v31  ;;  %v1811_v25 = vrot.slane %v2585_v40, %v2993_v31 }
 0x172   : > { %v1555_v19 = vrot.slane %v1547_v41, %v3003_v50  ;;  %v1562_v26 = vrot.slane %v1548_v34, %v3003_v50  ;;  %v1571_v45 = vrot.slane %v1563_v35, %v3003_v50  ;;  %v1578_v46 = vrot.slane %v1564_v42, %v3003_v50  ;;  %v876_v47 = vpop.trf.xlu1  ;;  %v844_v48 = vpop.trf.xlu0 }
 0x173   : > { %v1820_v49 = vcombine.high %v1763_v43, %v1779_v44  ;;  %v1852_v51 = vcombine.high %v1795_v18, %v1811_v25  ;;  %v1819_v52 = vcombine.low %v1763_v43, %v1779_v44  ;;  %v1851_v53 = vcombine.low %v1795_v18, %v1811_v25 }
 0x174   : > { %v2587_v54 = vcombine.low %v1555_v19, %v1562_v26  ;;  %v2589_v55 = vcombine.high %v1555_v19, %v1562_v26  ;;  %v2591_v56 = vcombine.low %v1571_v45, %v1578_v46  ;;  %v2593_v57 = vcombine.high %v1571_v45, %v1578_v46 }
 0x175   : > { %v1834_v58 = vrot.slane %v1820_v49, %v3003_v50  ;;  %v1866_v59 = vrot.slane %v1852_v51, %v3003_v50  ;;  %v3068_v60 = vrot.slane %v1819_v52, %v3003_v50  ;;  %v3071_v61 = vrot.slane %v1851_v53, %v3003_v50 }
 0x176   : > { %v939_v62 = vpop.trf.xlu1  ;;  %v907_v63 = vpop.trf.xlu0  ;;  %v3074_v0 = vrot.slane %v2587_v54, %v2993_v31  ;;  %v3077_v1 = vrot.slane %v2589_v55, %v2993_v31  ;;  %v3080_v2 = vrot.slane %v2591_v56, %v2993_v31  ;;  %v3083_v3 = vrot.slane %v2593_v57, %v2993_v31 }
 0x177   : > { %v1259_v4 = vcombine.low %v875_v33, %v939_v62  ;;  %v1260_v5 = vcombine.high %v875_v33, %v939_v62  ;;  %v1243_v6 = vcombine.low %v843_v36, %v907_v63  ;;  %v1244_v7 = vcombine.high %v843_v36, %v907_v63 }
 0x178   : > { %v1885_v8 = vcombine.low %v1834_v58, %v1866_v59  ;;  %v1884_v9 = vcombine.high %v3068_v60, %v3071_v61  ;;  %v1886_v10 = vcombine.high %v1834_v58, %v1866_v59  ;;  %v1956_v11 = vcombine.high %v3074_v0, %v3077_v1 }
 0x179   : > { %v1267_v12 = vrot.slane %v1259_v4, %v2993_v31  ;;  %v1274_v13 = vrot.slane %v1260_v5, %v2993_v31  ;;  %v1251_v14 = vrot.slane %v1243_v6, %v2993_v31  ;;  %v1258_v15 = vrot.slane %v1244_v7, %v2993_v31 }
 0x17a   : > { %2309 = vrot.lane.b32.xlu1 %v1885_v8, %s2820_s18  ;;  %2301 = vrot.lane.b32.xlu0 %v1884_v9, %s2821_s27  ;;  %v940_v16 = vpop.trf.xlu1  ;;  %v908_v17 = vpop.trf.xlu0  ;;  %v3096_v20 = vrot.slane %v1956_v11, %v3003_v50  ;;  %v1988_v21 = vcombine.high %v3080_v2, %v3083_v3  ;;  %v1955_v22 = vcombine.low %v3074_v0, %v3077_v1 }
 0x17b   : > { %v1307_v23 = vcombine.low %v1251_v14, %v1267_v12  ;;  %v1308_v24 = vcombine.high %v1251_v14, %v1267_v12  ;;  %v1323_v27 = vcombine.low %v1258_v15, %v1274_v13  ;;  %v1324_v28 = vcombine.high %v1258_v15, %v1274_v13 }
 0x17c   : > { %v1531_v29 = vcombine.low %v876_v47, %v940_v16  ;;  %v1532_v30 = vcombine.high %v876_v47, %v940_v16  ;;  %v1515_v32 = vcombine.low %v844_v48, %v908_v17  ;;  %v1516_v33 = vcombine.high %v844_v48, %v908_v17 }
 0x17d   : > { %v1315_v36 = vrot.slane %v1307_v23, %v3003_v50  ;;  %v1322_v37 = vrot.slane %v1308_v24, %v3003_v50  ;;  %v1331_v38 = vrot.slane %v1323_v27, %v3003_v50  ;;  %v1338_v39 = vrot.slane %v1324_v28, %v3003_v50 }
 0x17e   : > { %v1539_v40 = vrot.slane %v1531_v29, %v2993_v31  ;;  %v1546_v41 = vrot.slane %v1532_v30, %v2993_v31  ;;  %v1523_v34 = vrot.slane %v1515_v32, %v2993_v31  ;;  %v1530_v35 = vrot.slane %v1516_v33, %v2993_v31  ;;  %2317 = vrot.lane.b32.xlu1 %v1886_v10, %s2822_s29  ;;  %v1003_v42 = vpop.trf.xlu1  ;;  %v971_v43 = vpop.trf.xlu0 }
 0x17f   : > { %v2580_v44 = vcombine.low %v1315_v36, %v1322_v37  ;;  %v2582_v18 = vcombine.high %v1315_v36, %v1322_v37  ;;  %v2584_v25 = vcombine.low %v1331_v38, %v1338_v39  ;;  %v2586_v19 = vcombine.high %v1331_v38, %v1338_v39 }
 0x180   : > { %v1579_v26 = vcombine.low %v1523_v34, %v1539_v40  ;;  %v1580_v45 = vcombine.high %v1523_v34, %v1539_v40  ;;  %v1595_v46 = vcombine.low %v1530_v35, %v1546_v41  ;;  %v1596_v47 = vcombine.high %v1530_v35, %v1546_v41 }
 0x181   : > { %v3111_v48 = vrot.slane %v1988_v21, %v3003_v50  ;;  %v1770_v49 = vrot.slane %v2580_v44, %v2993_v31  ;;  %v1786_v51 = vrot.slane %v2582_v18, %v2993_v31  ;;  %v1802_v52 = vrot.slane %v2584_v25, %v2993_v31 }
 0x182   : > { %v1587_v53 = vrot.slane %v1579_v26, %v3003_v50  ;;  %v1594_v54 = vrot.slane %v1580_v45, %v3003_v50  ;;  %v1603_v55 = vrot.slane %v1595_v46, %v3003_v50  ;;  %v1610_v56 = vrot.slane %v1596_v47, %v3003_v50  ;;  %v1004_v57 = vpop.trf.xlu1  ;;  %v972_v58 = vpop.trf.xlu0 }
 0x183   : > { %v2022_v59 = vcombine.high %v3096_v20, %v3111_v48  ;;  %v1818_v62 = vrot.slane %v2586_v19, %v2993_v31  ;;  %v1835_v63 = vcombine.low %v1770_v49, %v1786_v51  ;;  %v1836_v4 = vcombine.high %v1770_v49, %v1786_v51 }
 0x184   : > { %v2588_v5 = vcombine.low %v1587_v53, %v1594_v54  ;;  %v2590_v6 = vcombine.high %v1587_v53, %v1594_v54  ;;  %v2592_v7 = vcombine.low %v1603_v55, %v1610_v56  ;;  %v2594_v8 = vcombine.high %v1603_v55, %v1610_v56 }
 0x185   : > { %2319 = vrot.lane.b32.xlu0 %v2022_v59, %s2822_s29  ;;  %v1843_v9 = vrot.slane %v1835_v63, %v3003_v50  ;;  %v1867_v10 = vcombine.low %v1802_v52, %v1818_v62  ;;  %v3125_v11 = vrot.slane %v1836_v4, %v3003_v50  ;;  %v1868_v12 = vcombine.high %v1802_v52, %v1818_v62 }
 0x186   : > { %v1067_v13 = vpop.trf.xlu1  ;;  %v1035_v14 = vpop.trf.xlu0  ;;  %v3128_v15 = vrot.slane %v2588_v5, %v2993_v31  ;;  %v3131_v16 = vrot.slane %v2590_v6, %v2993_v31  ;;  %v3134_v17 = vrot.slane %v2592_v7, %v2993_v31  ;;  %v3137_v21 = vrot.slane %v2594_v8, %v2993_v31 }
 0x187   : > { %v1363_v23 = vcombine.low %v1003_v42, %v1067_v13  ;;  %v1364_v24 = vcombine.high %v1003_v42, %v1067_v13  ;;  %v1347_v27 = vcombine.low %v971_v43, %v1035_v14  ;;  %v1348_v28 = vcombine.high %v971_v43, %v1035_v14 }
 0x188   : > { %v1875_v29 = vrot.slane %v1867_v10, %v3003_v50  ;;  %v1971_v30 = vcombine.low %v3128_v15, %v3131_v16  ;;  %v2003_v32 = vcombine.low %v3134_v17, %v3137_v21  ;;  %v3145_v33 = vrot.slane %v1868_v12, %v3003_v50 }
 0x189   : > { %v1371_v36 = vrot.slane %v1363_v23, %v2993_v31  ;;  %v1378_v37 = vrot.slane %v1364_v24, %v2993_v31  ;;  %v1355_v38 = vrot.slane %v1347_v27, %v2993_v31  ;;  %v1362_v39 = vrot.slane %v1348_v28, %v2993_v31 }
 0x18a   : > { %v1887_v40 = vcombine.low %v1843_v9, %v1875_v29  ;;  %v1068_v41 = vpop.trf.xlu1  ;;  %v1036_v34 = vpop.trf.xlu0  ;;  %v1888_v35 = vcombine.high %v1843_v9, %v1875_v29  ;;  %v3152_v42 = vrot.slane %v1971_v30, %v3003_v50  ;;  %v2011_v43 = vrot.slane %v2003_v32, %v3003_v50 }
 0x18b   : > { %v1411_v44 = vcombine.low %v1355_v38, %v1371_v36  ;;  %v1412_v18 = vcombine.high %v1355_v38, %v1371_v36  ;;  %v1427_v25 = vcombine.low %v1362_v39, %v1378_v37  ;;  %v1428_v19 = vcombine.high %v1362_v39, %v1378_v37 }
 0x18c   : > { %2325 = vrot.lane.b32.xlu1 %v1887_v40, %s2823_s30  ;;  %v1635_v26 = vcombine.low %v1004_v57, %v1068_v41  ;;  %v1636_v45 = vcombine.high %v1004_v57, %v1068_v41  ;;  %v1619_v46 = vcombine.low %v972_v58, %v1036_v34  ;;  %v1620_v47 = vcombine.high %v972_v58, %v1036_v34 }
 0x18d   : > { %v3157_v49 = vrot.slane %v1411_v44, %v3003_v50  ;;  %v3160_v51 = vrot.slane %v1412_v18, %v3003_v50  ;;  %v3163_v52 = vrot.slane %v1427_v25, %v3003_v50  ;;  %v3166_v53 = vrot.slane %v1428_v19, %v3003_v50 }
 0x18e   : > { %v1643_v54 = vrot.slane %v1635_v26, %v2993_v31  ;;  %v1650_v55 = vrot.slane %v1636_v45, %v2993_v31  ;;  %v1627_v56 = vrot.slane %v1619_v46, %v2993_v31  ;;  %v1634_v57 = vrot.slane %v1620_v47, %v2993_v31  ;;  %v1131_v58 = vpop.trf.xlu1  ;;  %v1099_v59 = vpop.trf.xlu0 }
 0x18f   : > { %v2595_v62 = vcombine.low %v3157_v49, %v3160_v51  ;;  %v2597_v63 = vcombine.high %v3157_v49, %v3160_v51  ;;  %v2599_v4 = vcombine.low %v3163_v52, %v3166_v53  ;;  %v2601_v5 = vcombine.high %v3163_v52, %v3166_v53 }
 0x190   : > { %v1683_v6 = vcombine.low %v1627_v56, %v1643_v54  ;;  %v1684_v7 = vcombine.high %v1627_v56, %v1643_v54  ;;  %v1699_v8 = vcombine.low %v1634_v57, %v1650_v55  ;;  %v1700_v9 = vcombine.high %v1634_v57, %v1650_v55  ;;  %2333 = vrot.lane.b32.xlu1 %v1888_v35, %s2824_s2 }
 0x191   : > { %v2023_v10 = vcombine.low %v3152_v42, %v2011_v43  ;;  %v1889_v12 = vcombine.low %v3125_v11, %v3145_v33  ;;  %v2024_v13 = vcombine.high %v3152_v42, %v2011_v43  ;;  %v1890_v14 = vcombine.high %v3125_v11, %v3145_v33 }
 0x192   : > { %v1691_v23 = vrot.slane %v1683_v6, %v3003_v50  ;;  %v1698_v24 = vrot.slane %v1684_v7, %v3003_v50  ;;  %v1707_v27 = vrot.slane %v1699_v8, %v3003_v50  ;;  %v1714_v28 = vrot.slane %v1700_v9, %v3003_v50  ;;  %v1132_v29 = vpop.trf.xlu1  ;;  %v1100_v30 = vpop.trf.xlu0 }
 0x193   : > { %2327 = vrot.lane.b32.xlu0 %v2023_v10, %s2823_s30  ;;  %v1972_v32 = vcombine.high %v3128_v15, %v3131_v16  ;;  %v2004_v36 = vcombine.high %v3134_v17, %v3137_v21  ;;  %v3200_v11 = vrot.slane %v1955_v22, %v3003_v50  ;;  %v1987_v33 = vcombine.low %v3080_v2, %v3083_v3 }
 0x194   : > { %v2603_v37 = vcombine.low %v1691_v23, %v1698_v24  ;;  %v2605_v38 = vcombine.high %v1691_v23, %v1698_v24  ;;  %v2607_v39 = vcombine.low %v1707_v27, %v1714_v28  ;;  %v2609_v40 = vcombine.high %v1707_v27, %v1714_v28  ;;  %2341 = vrot.lane.b32.xlu1 %v1889_v12, %s2825_s5 }
 0x195   : > { %v1986_v15 = vrot.slane %v1972_v32, %v3003_v50  ;;  %v2018_v16 = vrot.slane %v2004_v36, %v3003_v50  ;;  %v3208_v17 = vrot.slane %v1987_v33, %v3003_v50  ;;  %v2021_v0 = vcombine.low %v3096_v20, %v3111_v48 }
 0x196   : > { %v1195_v1 = vpop.trf.xlu1  ;;  %v1163_v22 = vpop.trf.xlu0  ;;  %v3213_v2 = vrot.slane %v2603_v37, %v2993_v31  ;;  %v3216_v3 = vrot.slane %v2605_v38, %v2993_v31  ;;  %v3219_v21 = vrot.slane %v2607_v39, %v2993_v31  ;;  %v3222_v41 = vrot.slane %v2609_v40, %v2993_v31 }
 0x197   : > { %2335 = vrot.lane.b32.xlu0 %v2024_v13, %s2824_s2  ;;  %v2025_v34 = vcombine.low %v1986_v15, %v2018_v16  ;;  %v1395_v35 = vcombine.low %v1131_v58, %v1195_v1  ;;  %v1396_v42 = vcombine.high %v1131_v58, %v1195_v1  ;;  %v1379_v20 = vcombine.low %v1099_v59, %v1163_v22 }
 0x198   : > { %2349 = vrot.lane.b32.xlu1 %v1890_v14, %s2826_s12  ;;  %v1380_v48 = vcombine.high %v1099_v59, %v1163_v22  ;;  %v2020_v43 = vcombine.high %v3200_v11, %v3208_v17  ;;  %v2026_v44 = vcombine.high %v1986_v15, %v2018_v16  ;;  %v2227_v18 = vcombine.low %v3213_v2, %v3216_v3 }
 0x199   : > { %v1403_v25 = vrot.slane %v1395_v35, %v2993_v31  ;;  %v1410_v19 = vrot.slane %v1396_v42, %v2993_v31  ;;  %v1387_v26 = vrot.slane %v1379_v20, %v2993_v31  ;;  %v2259_v45 = vcombine.low %v3219_v21, %v3222_v41 }
 0x19a   : > { %v1394_v46 = vrot.slane %v1380_v48, %v2993_v31  ;;  %v1196_v47 = vpop.trf.xlu1  ;;  %v1164_v49 = vpop.trf.xlu0  ;;  %v2235_v51 = vrot.slane %v2227_v18, %v3003_v50  ;;  %v3238_v54 = vrot.slane %v2595_v62, %v2993_v31  ;;  %v3241_v55 = vrot.slane %v2597_v63, %v2993_v31 }
 0x19b   : > { %2343 = vrot.lane.b32.xlu0 %v2025_v34, %s2825_s5  ;;  %v1443_v56 = vcombine.low %v1387_v26, %v1403_v25  ;;  %v1444_v57 = vcombine.high %v1387_v26, %v1403_v25  ;;  %v1667_v58 = vcombine.low %v1132_v29, %v1196_v47  ;;  %v1668_v59 = vcombine.high %v1132_v29, %v1196_v47  ;;  %s2731_s5 = scalar_lea.vmem %s3335_s4, 256 }
 0x19c   : > { %v1459_v6 = vcombine.low %v1394_v46, %v1410_v19  ;;  %v1460_v7 = vcombine.high %v1394_v46, %v1410_v19  ;;  %2303 = vrot.lane.b32.xlu1 %v2020_v43, %s2821_s27  ;;  %v1651_v8 = vcombine.low %v1100_v30, %v1164_v49  ;;  %v1652_v9 = vcombine.high %v1100_v30, %v1164_v49  ;;  %p2732_p8 = scmp.ne.s32.totalorder %s3335_s4, %s2731_s5 }
 0x19d   : > { %v1451_v10 = vrot.slane %v1443_v56, %v3003_v50  ;;  %v1458_v62 = vrot.slane %v1444_v57, %v3003_v50  ;;  %v1675_v12 = vrot.slane %v1667_v58, %v2993_v31  ;;  %v1682_v63 = vrot.slane %v1668_v59, %v2993_v31 }
 0x19e   : > { %v1467_v13 = vrot.slane %v1459_v6, %v3003_v50  ;;  %v1474_v14 = vrot.slane %v1460_v7, %v3003_v50  ;;  %v1659_v23 = vrot.slane %v1651_v8, %v2993_v31  ;;  %v1666_v24 = vrot.slane %v1652_v9, %v2993_v31  ;;  %p2733_p11 = pnand %p2732_p8, %p3401_p9 }
 0x19f   : > { %v2596_v27 = vcombine.low %v1451_v10, %v1458_v62  ;;  %2351 = vrot.lane.b32.xlu0 %v2026_v44, %s2826_s12  ;;  %v2267_v28 = vrot.slane %v2259_v45, %v3003_v50  ;;  %v2067_v29 = vrot.slane %v2599_v4, %v2993_v31  ;;  %v2598_v30 = vcombine.high %v1451_v10, %v1458_v62  ;;  %s2835_s12 = smov [#allocation5]  }
 0x1a0   : > { %v2600_v32 = vcombine.low %v1467_v13, %v1474_v14  ;;  %v1715_v36 = vcombine.low %v1659_v23, %v1675_v12  ;;  %v1716_v33 = vcombine.high %v1659_v23, %v1675_v12  ;;  %2311 = vrot.lane.b32.xlu1 %v2021_v0, %s2820_s18  ;;  %v1731_v37 = vcombine.low %v1666_v24, %v1682_v63  ;;  %s2617_s18 = sshll.u32 %s2805_s9, 8  ;;  %s2467_s9 = scalar_lea.sflag [#allocation4], %s2959_s26 }
 0x1a1   : > { %v1732_v38 = vcombine.high %v1666_v24, %v1682_v63  ;;  %v2291_v39 = vcombine.low %v2235_v51, %v2267_v28  ;;  %v2083_v40 = vrot.slane %v2601_v5, %v2993_v31  ;;  %v2091_v4 = vcombine.low %v3238_v54, %v3241_v55  ;;  %s3341_s2 = scalar_lea.hbm %s3393_s1, %s2617_s18  ;;  %p2734_p0 = pneg %p2733_p11 }
 0x1a2   : > { %v1723_v15 = vrot.slane %v1715_v36, %v3003_v50  ;;  %v1730_v16 = vrot.slane %v1716_v33, %v3003_v50  ;;  %v2292_v1 = vcombine.high %v2235_v51, %v2267_v28  ;;  %v1739_v22 = vrot.slane %v1731_v37, %v3003_v50 }
 0x1a3   : > { %v1746_v0 = vrot.slane %v1732_v38, %v3003_v50  ;;  %2359 = vrot.lane.b32.xlu0 %v2291_v39, %s2827_s13  ;;  %v2123_v34 = vcombine.low %v2067_v29, %v2083_v40  ;;  %v2228_v35 = vcombine.high %v3213_v2, %v3216_v3  ;;  %v2099_v5 = vrot.slane %v2091_v4, %v3003_v50 }
 0x1a4   : > { %v2604_v52 = vcombine.low %v1723_v15, %v1730_v16  ;;  %v2606_v53 = vcombine.high %v1723_v15, %v1730_v16  ;;  %v2260_v42 = vcombine.high %v3219_v21, %v3222_v41  ;;  %v2092_v25 = vcombine.high %v3238_v54, %v3241_v55 }
 0x1a5   : > { %v2608_v20 = vcombine.low %v1739_v22, %v1746_v0  ;;  %v2610_v48 = vcombine.high %v1739_v22, %v1746_v0  ;;  %v2131_v43 = vrot.slane %v2123_v34, %v3003_v50  ;;  %v2242_v44 = vrot.slane %v2228_v35, %v3003_v50 }
 0x1a6   : > { %v2274_v18 = vrot.slane %v2260_v42, %v3003_v50  ;;  %v2124_v19 = vcombine.high %v2067_v29, %v2083_v40  ;;  %v2178_v2 = vrot.slane %v2604_v52, %v2993_v31  ;;  %v2602_v3 = vcombine.high %v1467_v13, %v1474_v14 }
 0x1a7   : > { %v2155_v26 = vcombine.low %v2099_v5, %v2131_v43  ;;  %2367 = vrot.lane.b32.xlu0 %v2292_v1, %s2828_s15  ;;  %v2194_v21 = vrot.slane %v2606_v53, %v2993_v31  ;;  %v2210_v41 = vrot.slane %v2608_v20, %v2993_v31  ;;  %v2156_v45 = vcombine.high %v2099_v5, %v2131_v43 }
 0x1a8   : > { %v2293_v46 = vcombine.low %v2242_v44, %v2274_v18  ;;  %v2226_v47 = vrot.slane %v2610_v48, %v2993_v31  ;;  %v2106_v51 = vrot.slane %v2092_v25, %v3003_v50  ;;  %v2138_v54 = vrot.slane %v2124_v19, %v3003_v50 }
 0x1a9   : > { %2357 = vrot.lane.b32.xlu1 %v2155_v26, %s2827_s13  ;;  %v2243_v49 = vcombine.low %v2178_v2, %v2194_v21  ;;  %v2042_v55 = vrot.slane %v2596_v27, %v2993_v31  ;;  %v2058_v56 = vrot.slane %v2598_v30, %v2993_v31  ;;  %v2074_v59 = vrot.slane %v2600_v32, %v2993_v31  ;;  %s2735_s13 = sshll.u32 %s2835_s12, 4  ;;  %s2736_s13 = int_to_ptr.vmem [resolvable:$false] %s2735_s13 }
 0x1aa   : > { %v2275_v58 = vcombine.low %v2210_v41, %v2226_v47  ;;  %v2090_v6 = vrot.slane %v2602_v3, %v2993_v31  ;;  %v2294_v7 = vcombine.high %v2242_v44, %v2274_v18  ;;  %v1883_v9 = vcombine.low %v3068_v60, %v3071_v61  ;;  %p2738_p6 = scmp.lt.s32.totalorder %s3335_s4, %s2736_s13 }
 0x1ab   : > { %2375 = vrot.lane.b32.xlu0 %v2293_v46, %s2829_s16  ;;  %v2251_v57 = vrot.slane %v2243_v49, %v3003_v50  ;;  %v2157_v10 = vcombine.low %v2106_v51, %v2138_v54  ;;  %v2107_v12 = vcombine.low %v2042_v55, %v2058_v56  ;;  %v2244_v13 = vcombine.high %v2178_v2, %v2194_v21 }
 0x1ac   : > { %v2283_v8 = vrot.slane %v2275_v58, %v3003_v50  ;;  %v2139_v63 = vcombine.low %v2074_v59, %v2090_v6  ;;  %v2276_v14 = vcombine.high %v2210_v41, %v2226_v47  ;;  %v2019_v23 = vcombine.low %v3200_v11, %v3208_v17 }
 0x1ad   : > { %2365 = vrot.lane.b32.xlu1 %v2156_v45, %s2828_s15  ;;  %v2158_v31 = vcombine.high %v2106_v51, %v2138_v54  ;;  %v2115_v24 = vrot.slane %v2107_v12, %v3003_v50  ;;  %v2258_v29 = vrot.slane %v2244_v13, %v3003_v50  ;;  %v2108_v36 = vcombine.high %v2042_v55, %v2058_v56  ;;  %s2737_s15 = scalar_lea.vmem %s2736_s13, 512 }
 0x1ae   : > { %v2295_v62 = vcombine.low %v2251_v57, %v2283_v8  ;;  %v2147_v27 = vrot.slane %v2139_v63, %v3003_v50  ;;  %v2296_v28 = vcombine.high %v2251_v57, %v2283_v8  ;;  %v2290_v30 = vrot.slane %v2276_v14, %v3003_v50  ;;  %p2739_p13 = scmp.lt.s32.totalorder %s2737_s15, %s2731_s5 }
 0x1af   : > { %2383 = vrot.lane.b32.xlu0 %v2294_v7, %s2830_s17  ;;  %v2140_v33 = vcombine.high %v2074_v59, %v2090_v6  ;;  %v2122_v37 = vrot.slane %v2108_v36, %v3003_v50 }
 0x1b0   : > { %v2159_v32 = vcombine.low %v2115_v24, %v2147_v27  ;;  %v2297_v11 = vcombine.low %v2258_v29, %v2290_v30  ;;  %v2160_v17 = vcombine.high %v2115_v24, %v2147_v27  ;;  %v2298_v39 = vcombine.high %v2258_v29, %v2290_v30  ;;  %p2740_p2 = por %p2739_p13, %p2738_p6 }
 0x1b1   : > { %2373 = vrot.lane.b32.xlu1 %v2157_v10, %s2829_s16  ;;  %v2154_v38 = vrot.slane %v2140_v33, %v3003_v50 }
 0x1b2   : > { %p2741_p5 = pnand %p2740_p2, %p2734_p0 }
 0x1b3   : > { %2391 = vrot.lane.b32.xlu0 %v2295_v62, %s2831_s22  ;;  %v2161_v40 = vcombine.low %v2122_v37, %v2154_v38  ;;  %v2162_v15 = vcombine.high %v2122_v37, %v2154_v38 }
 0x1b5   : > { %2381 = vrot.lane.b32.xlu1 %v2158_v31, %s2830_s17 }
 0x1b7   : > { %2399 = vrot.lane.b32.xlu0 %v2296_v28, %s2832_s23 }
 0x1b9   : > { %2389 = vrot.lane.b32.xlu1 %v2159_v32, %s2831_s22 }
 0x1bb   : > { %2407 = vrot.lane.b32.xlu0 %v2297_v11, %s2833_s24 }
 0x1bd   : > { %2397 = vrot.lane.b32.xlu1 %v2160_v17, %s2832_s23 }
 0x1bf   : > { %2415 = vrot.lane.b32.xlu0 %v2298_v39, %s2834_s25 }
 0x1c1   : > { %2405 = vrot.lane.b32.xlu1 %v2161_v40, %s2833_s24 }
 0x1c5   : > { %2413 = vrot.lane.b32.xlu1 %v2162_v15, %s2834_s25 }
 0x1ec   : > { %v2310_v16 = vpop.permute.xlu1 %2309  ;;  %v2302_v1 = vpop.permute.xlu0 %2301 }
 0x1ed   : > { %v2420_v56 = vsel %vm2419_vm0, %v1883_v9, %v2302_v1 }
 0x1ee   : > { %v2423_v59 = vsel %vm2422_vm1, %v2420_v56, %v2310_v16 }
 0x1f0   : > { %v2318_v4 = vpop.permute.xlu1 %2317 }
 0x1f1   : > { %v2426_v7 = vsel %vm2425_vm2, %v2423_v59, %v2318_v4 }
 0x1f7   : > { %v2320_v0 = vpop.permute.xlu0 %2319 }
 0x1fe   : > { %v2326_v22 = vpop.permute.xlu1 %2325 }
 0x1ff   : > { %v2429_v8 = vsel %vm2428_vm3, %v2426_v7, %v2326_v22 }
 0x202   : > { %v2334_v34 = vpop.permute.xlu1 %2333 }
 0x203   : > { %v2432_v60 = vsel %vm2431_vm4, %v2429_v8, %v2334_v34 }
 0x205   : > { %v2328_v35 = vpop.permute.xlu0 %2327 }
 0x206   : > { %v2342_v52 = vpop.permute.xlu1 %2341 }
 0x207   : > { %v2435_v9 = vsel %vm2434_vm5, %v2432_v60, %v2342_v52 }
 0x209   : > { %v2336_v53 = vpop.permute.xlu0 %2335 }
 0x20a   : > { %v2350_v5 = vpop.permute.xlu1 %2349 }
 0x20b   : > { %v2438_v13 = vsel %vm2437_vm6, %v2435_v9, %v2350_v5 }
 0x20d   : > { %v2344_v42 = vpop.permute.xlu0 %2343 }
 0x20e   : > { %v2304_v50 = vpop.permute.xlu1 %2303 }
 0x20f   : > { %v2421_v43 = vsel %vm2419_vm0, %v2019_v23, %v2304_v50 }
 0x211   : > { %v2352_v20 = vpop.permute.xlu0 %2351 }
 0x212   : > { %v2312_v48 = vpop.permute.xlu1 %2311 }
 0x213   : > { %v2424_v44 = vsel %vm2422_vm1, %v2421_v43, %v2312_v48 }
 0x214   : > { %v2427_v25 = vsel %vm2425_vm2, %v2424_v44, %v2320_v0 }
 0x215   : > { %v2360_v18 = vpop.permute.xlu0 %2359  ;;  %v2430_v2 = vsel %vm2428_vm3, %v2427_v25, %v2328_v35 }
 0x216   : > { %v2433_v21 = vsel %vm2431_vm4, %v2430_v2, %v2336_v53 }
 0x217   : > { %v2436_v45 = vsel %vm2434_vm5, %v2433_v21, %v2344_v42 }
 0x218   : > { %v2439_v49 = vsel %vm2437_vm6, %v2436_v45, %v2352_v20 }
 0x219   : > { %v2368_v19 = vpop.permute.xlu0 %2367  ;;  %v2442_v54 = vsel %vm2440_vm7, %v2439_v49, %v2360_v18 }
 0x21a   : > { %v2445_v58 = vsel %vm2443_vm8, %v2442_v54, %v2368_v19 }
 0x21b   : > { %v2358_v3 = vpop.permute.xlu1 %2357 }
 0x21c   : > { %v2441_v23 = vsel %vm2440_vm7, %v2438_v13, %v2358_v3 }
 0x21d   : > { %v2376_v26 = vpop.permute.xlu0 %2375 }
 0x21e   : > { %v2448_v10 = vsel %vm2446_vm9, %v2445_v58, %v2376_v26 }
 0x21f   : > { %v2366_v41 = vpop.permute.xlu1 %2365 }
 0x220   : > { %v2444_v27 = vsel %vm2443_vm8, %v2441_v23, %v2366_v41 }
 0x221   : > { %v2384_v46 = vpop.permute.xlu0 %2383 }
 0x222   : > { %v2451_v61 = vsel %vm2449_vm10, %v2448_v10, %v2384_v46 }
 0x223   : > { %v2374_v47 = vpop.permute.xlu1 %2373 }
 0x224   : > { %v2447_v29 = vsel %vm2446_vm9, %v2444_v27, %v2374_v47 }
 0x225   : > { %v2392_v51 = vpop.permute.xlu0 %2391 }
 0x226   : > { %v2454_v12 = vsel %vm2452_vm11, %v2451_v61, %v2392_v51 }
 0x227   : > { %v2382_v55 = vpop.permute.xlu1 %2381 }
 0x228   : > { %v2450_v32 = vsel %vm2449_vm10, %v2447_v29, %v2382_v55 }
 0x229   : > { %v2400_v57 = vpop.permute.xlu0 %2399 }
 0x22a   : > { %v2457_v14 = vsel %vm2455_vm12, %v2454_v12, %v2400_v57 }
 0x22b   : > { %v2390_v6 = vpop.permute.xlu1 %2389 }
 0x22c   : > { %v2453_v36 = vsel %vm2452_vm11, %v2450_v32, %v2390_v6 }
 0x22d   : > { %v2408_v62 = vpop.permute.xlu0 %2407 }
 0x22e   : > { %v2460_v31 = vsel %vm2458_vm13, %v2457_v14, %v2408_v62 }
 0x22f   : > { %v2398_v63 = vpop.permute.xlu1 %2397 }
 0x230   : > { %v2456_v33 = vsel %vm2455_vm12, %v2453_v36, %v2398_v63 }
 0x231   : > { %v2416_v24 = vpop.permute.xlu0 %2415 }
 0x232   : > { %v2463_v28 = vsel %vm2461_vm14, %v2460_v31, %v2416_v24 }
 0x233   : > { %v2406_v30 = vpop.permute.xlu1 %2405  ;;  %2465 = vst [vmem:[%s152_s3 + $0x8] sm:$0xff] %v2463_v28 }
 0x234   : > { %v2459_v11 = vsel %vm2458_vm13, %v2456_v33, %v2406_v30 }
 0x237   : > { %v2414_v17 = vpop.permute.xlu1 %2413 }
 0x238   : > { %v2462_v37 = vsel %vm2461_vm14, %v2459_v11, %v2414_v17 }
 0x239   : > { %2464 = vst [vmem:[%s152_s3] sm:$0xff] %v2462_v37 }
 0x23a   : > { %2744 = shalt.err (!%p2741_p5)
}
 0x23b   : > { %s2745_s16 = scalar_lea.hbm %s3341_s2, 256  ;;  %s2749_s23 = scalar_lea.hbm %s3393_s1, 512 }
 0x23c   : > { %p2746_p4 = scmp.ne.s32.totalorder %s3341_s2, %s2745_s16  ;;  %p2750_p12 = scmp.lt.u32.totalorder %s3341_s2, %s3393_s1 }
 0x23d   : > { %p2751_p1 = scmp.lt.u32.totalorder %s2749_s23, %s2745_s16  ;;  %p2753_p8 = scmp.lt.u32.totalorder %s2745_s16, %s3341_s2 }
 0x23e   : > { %p2747_p7 = pnand %p2746_p4, %p3401_p9 }
 0x23f   : > { %p2752_p3 = por %p2751_p1, %p2750_p12 }
 0x240   : > { %p2748_p10 = pneg %p2747_p7 }
 0x241   : > { %p2754_p11 = por %p2753_p8, %p2752_p3 }
 0x243   : > { %p2755_p0 = pnand %p2754_p11, %p2748_p10 }
 0x245   : > { %2758 = shalt.err (!%p2755_p0)
}
 0x246   : > { %s2836_s28 = smov 128  }
 0x247   : > { %2620 = dma.vmem_to_hbm [thread:$0]  (%p3401_p9), %s3335_s4, 256, %s3341_s2, %s2467_s9, %s2836_s28, %s2836_s28, %s2821_s27  }
 0x248 PF: > { %s2497_s3 = sand.u32 1, %s2793_s6   ;;  %p3402_p6 = scmp.ne.s32.totalorder %s3398_s21, 0 }
 0x249   : > { %p3403_p13 = scmp.ge.s32.totalorder %s2813_s11, 2  ;;  %s2498_s18 = scalar_lea.sflag [#allocation4], %s2497_s3 }
 0x24b   : > { %p2627_p2 = pnand %p3403_p13, %p3402_p6 }
 0x24d   : > { %2788 = dma.done.wait (!%p2627_p2), %s2498_s18, 256  }
 0x24e   : > { %2790 = vsyncadd (!%p2627_p2), %s2498_s18, 4294967040  ;;  %s17_s11 = sadd.s32 1, %s2813_s11   ;;  %s3404_s6 = smov %s2797_s7 }
 0x24f   : > { %p14_p5 = scmp.ge.s32.totalorder %s17_s11, 4   ;;  %s3405_s7 = smov %s2801_s8 }
 0x250   : > { %s3406_s8 = smov %s2903_s20  ;;  %s3407_s9 = smov %s2809_s10 }
 0x251   : > { %s3408_s10 = smov %s3410_s14  ;;  %16 = sbr.rel (!%p14_p5) target bundleno = 6 (0x6), region = 69 }
 0x258   :  { %2503 = vsyncpa [#allocation3], 1 }
 0x259   :  { %2505 = vsyncpa [#allocation3 + $0x1], 1 }
 0x25a   :  { %2506 = vsyncpa [#allocation4], 1 }
 0x25b   :  { %2508 = vsyncpa [#allocation4 + $0x1], 1 }

</bundles_post_ra>
